<compile_context>
chip_gen: v6e
topology: v6e:2x2x1
jax: 0.10.0
libtpu: 0.0.40
codegen_flags: <defaults>
</compile_context>

<pallas_src>
import functools

import jax
import jax.numpy as jnp
from jax.experimental import pallas as pl
from jax.experimental.pallas import tpu as pltpu

_NEG_SLOPE = 0.1  # LeakyReLU slope used by the PyTorch module


def _channel_attn_kernel(x_ref, w1_ref, b1_ref, w2t_ref, b2_ref, o_ref,
                         sum_acc, max_acc, *, inv_spatial):
    # x_ref   : (BN, C, TS)  VMEM  -- one spatial tile of BN batch elements
    # w1_ref  : (MID, C)     VMEM  -- Linear1 weight (PyTorch (out,in) layout)
    # b1_ref  : (MID,)       SMEM  -- Linear1 bias (scalars)
    # w2t_ref : (MID, C)     VMEM  -- Linear2 weight transposed (rows lane-dense)
    # b2_ref  : (1, C)       VMEM  -- Linear2 bias
    # o_ref   : (BN, C)      VMEM  -- sigmoid(mlp(avg) + mlp(max))
    # sum_acc / max_acc : (BN, C) f32 VMEM scratch, accumulated over spatial tiles
    s = pl.program_id(1)
    bn, c = sum_acc.shape
    mid = w1_ref.shape[0]

    @pl.when(s == 0)
    def _():
        sum_acc[...] = jnp.zeros_like(sum_acc)
        max_acc[...] = jnp.full(max_acc.shape, -jnp.inf, dtype=max_acc.dtype)

    # Whole-block channelwise reduction over the lane-dense spatial axis.
    xf = x_ref[...].astype(jnp.float32)                      # (BN, C, TS)
    sum_acc[...] = sum_acc[...] + jnp.sum(xf, axis=-1)       # (BN, C)
    max_acc[...] = jnp.maximum(max_acc[...], jnp.max(xf, axis=-1))

    @pl.when(s == pl.num_programs(1) - 1)
    def _():
        w1 = w1_ref[...].astype(jnp.float32)                 # (MID, C)
        w2t = w2t_ref[...].astype(jnp.float32)               # (MID, C)
        b2 = b2_ref[...].astype(jnp.float32)                 # (1, C)

        def mlp(p):                                          # p: (BN, C) f32
            acc = jnp.zeros((bn, c), jnp.float32)
            for m in range(mid):                             # MID is small & static
                w1_row = w1[m:m + 1, :]                      # (1, C)
                h = jnp.sum(p * w1_row, axis=-1, keepdims=True) + b1_ref[m]
                h = jnp.where(h >= 0.0, h, _NEG_SLOPE * h)   # LeakyReLU(0.1)
                acc = acc + h * w2t[m:m + 1, :]              # (BN,1)*(1,C)
            return acc + b2                                  # (BN, C)

        avg = sum_acc[...] * inv_spatial
        mx = max_acc[...]
        y = jax.nn.sigmoid(mlp(avg) + mlp(mx))
        o_ref[...] = y.astype(o_ref.dtype)


def _largest_divisor_leq(n, cap):
    cap = max(1, min(n, cap))
    for d in range(cap, 0, -1):
        if n % d == 0:
            return d
    return 1


def _pick_spatial_tile(C, S, itemsize, max_block_bytes=2 * 1024 * 1024):
    if C * S * itemsize <= max_block_bytes or S % 128 != 0:
        return S
    t = (max_block_bytes // (C * itemsize)) // 128 * 128
    while t >= 128:
        if S % t == 0:
            return t
        t -= 128
    # TODO(synk): very large S with no 128-multiple divisor falls back to full-S blocks.
    return S


def channel_attention(x, w1, b1, w2, b2):
    """CBAM channel attention.

    x  : (N, C, H, W)
    w1 : (MID, C), b1: (MID,)   -- nn.Linear(C, MID) params (PyTorch (out,in) layout)
    w2 : (C, MID), b2: (C,)     -- nn.Linear(MID, C) params
    Returns sigmoid(mlp(avgpool(x)) + mlp(maxpool(x))) of shape (N, C, 1, 1).
    """
    N, C, H, W = x.shape
    S = H * W
    mid = w1.shape[0]
    itemsize = jnp.dtype(x.dtype).itemsize

    x2 = x.reshape(N, C, S)                     # spatial axis lane-dense
    w1f = w1.astype(jnp.float32)                # (MID, C)
    b1f = b1.reshape(-1).astype(jnp.float32)    # (MID,)
    w2t = w2.T.astype(jnp.float32)              # (MID, C): rows broadcast over lanes
    b2f = b2.reshape(1, C).astype(jnp.float32)  # (1, C)

    ts = _pick_spatial_tile(C, S, itemsize)
    bn_cap = max(1, (2 * 1024 * 1024) // max(1, C * ts * itemsize))
    if N > 1:
        bn_cap = min(bn_cap, max(1, N // 2))    # keep >=2 parallel steps (v7x megacore)
    bn = _largest_divisor_leq(N, bn_cap)

    grid = (N // bn, S // ts)

    kernel = functools.partial(_channel_attn_kernel, inv_spatial=1.0 / S)

    out3 = pl.pallas_call(
        kernel,
        out_shape=jax.ShapeDtypeStruct((N, 1, C), x.dtype),
        grid_spec=pltpu.PrefetchScalarGridSpec(
            num_scalar_prefetch=0,
            grid=grid,
            in_specs=[
                pl.BlockSpec((bn, C, ts), lambda b, s: (b, 0, s)),
                pl.BlockSpec((mid, C), lambda b, s: (0, 0)),
                pl.BlockSpec(memory_space=pltpu.MemorySpace.SMEM),
                pl.BlockSpec((mid, C), lambda b, s: (0, 0)),
                pl.BlockSpec((1, C), lambda b, s: (0, 0)),
            ],
            out_specs=pl.BlockSpec((bn, None, C), lambda b, s: (b, 0, 0)),
            scratch_shapes=[
                pltpu.VMEM((bn, C), jnp.float32),   # running sum
                pltpu.VMEM((bn, C), jnp.float32),   # running max
            ],
        ),
        compiler_params=pltpu.CompilerParams(
            dimension_semantics=("parallel", "arbitrary")),
    )(x2, w1f, b1f, w2t, b2f)

    return out3.reshape(N, C, 1, 1)


def _reference(x, w1, b1, w2, b2):
    avg = jnp.mean(x, axis=(2, 3))               # (N, C)
    mx = jnp.max(x, axis=(2, 3))                 # (N, C)

    def mlp(p):
        h = p @ w1.T + b1
        h = jnp.where(h >= 0.0, h, _NEG_SLOPE * h)
        return h @ w2.T + b2

    y = jax.nn.sigmoid(mlp(avg) + mlp(mx))
    return y[:, :, None, None]


if __name__ == "__main__":
    key = jax.random.PRNGKey(0)
    kx, k1, kb1, k2, kb2 = jax.random.split(key, 5)

    # c1 must be >= reduction so the MLP's hidden width (c1 // reduction) is >= 1.
    N, C, H, W = 2, 32, 16, 16
    reduction = 16
    mid = C // reduction                                          # 2

    x = jax.random.normal(kx, (N, C, H, W), dtype=jnp.float32)

    # Deterministic Linear init (PyTorch-style U(-1/sqrt(fan_in), +1/sqrt(fan_in))).
    bd1 = 1.0 / (C ** 0.5)
    w1 = jax.random.uniform(k1, (mid, C), jnp.float32, -bd1, bd1)  # Linear(C, mid)
    b1 = jax.random.uniform(kb1, (mid,), jnp.float32, -bd1, bd1)
    bd2 = 1.0 / (mid ** 0.5)
    w2 = jax.random.uniform(k2, (C, mid), jnp.float32, -bd2, bd2)  # Linear(mid, C)
    b2 = jax.random.uniform(kb2, (C,), jnp.float32, -bd2, bd2)

    out = channel_attention(x, w1, b1, w2, b2)
    out = jax.block_until_ready(out)

    ref = _reference(x, w1, b1, w2, b2)
    assert out.shape == (N, C, 1, 1)
    assert jnp.allclose(out, ref, rtol=1e-5, atol=1e-5), "mismatch vs reference"

    print("KERNEL_OK")
</pallas_src>

<mosaic_0001>
module attributes {stable_mosaic.version = 11 : i64} {
  func.func @_channel_attn_kernel(%arg0: i32, %arg1: i32, %arg2: memref<1x32x256xf32, #tpu.memory_space<vmem>>, %arg3: memref<2x32xf32, #tpu.memory_space<vmem>>, %arg4: memref<2xf32, #tpu.memory_space<smem>>, %arg5: memref<2x32xf32, #tpu.memory_space<vmem>>, %arg6: memref<1x32xf32, #tpu.memory_space<vmem>>, %arg7: memref<1x1x32xf32, #tpu.memory_space<vmem>>, %arg8: memref<1x32xf32, #tpu.memory_space<vmem>>, %arg9: memref<1x32xf32, #tpu.memory_space<vmem>>) attributes {dimension_semantics = [#tpu.dimension_semantics<parallel>, #tpu.dimension_semantics<arbitrary>], iteration_bounds = array<i64: 2, 1>, scalar_prefetch = 0 : i64, scratch_operands = 2 : i64, tpu.core_type = #tpu.core_type<tc>, window_params = [{transform_indices = @transform_0, window_bounds = array<i64: 1, 32, 256>}, {pipeline_mode = #tpu.pipeline_mode<synchronous>, transform_indices = @transform_1, window_bounds = array<i64: 2, 32>}, {transform_indices = @transform_2, window_bounds = array<i64: 2>}, {pipeline_mode = #tpu.pipeline_mode<synchronous>, transform_indices = @transform_3, window_bounds = array<i64: 2, 32>}, {pipeline_mode = #tpu.pipeline_mode<synchronous>, transform_indices = @transform_4, window_bounds = array<i64: 1, 32>}, {transform_indices = @transform_5, window_bounds = array<i64: 1, 1, 32>}]} {
    %c0_i32 = arith.constant 0 : i32
    %0 = arith.cmpi eq, %arg1, %c0_i32 : i32
    %1 = arith.extui %0 : i1 to i32
    %c0_i32_0 = arith.constant 0 : i32
    %2 = arith.cmpi ne, %1, %c0_i32_0 : i32
    scf.if %2 {
      %cst_14 = arith.constant 0.000000e+00 : f32
      %15 = vector.broadcast %cst_14 : f32 to vector<1x32xf32>
      %c0_15 = arith.constant 0 : index
      %c0_16 = arith.constant 0 : index
      %16 = vector.load %arg8[%c0_15, %c0_16] : memref<1x32xf32, #tpu.memory_space<vmem>>, vector<1x32xf32>
      tpu.vector_store %arg8[%c0_15, %c0_16], %15 {strides = array<i32>} : memref<1x32xf32, #tpu.memory_space<vmem>>, vector<1x32xf32>,
      %cst_17 = arith.constant 0xFF800000 : f32
      %17 = vector.broadcast %cst_17 : f32 to vector<1x32xf32>
      %c0_18 = arith.constant 0 : index
      %c0_19 = arith.constant 0 : index
      %18 = vector.load %arg9[%c0_18, %c0_19] : memref<1x32xf32, #tpu.memory_space<vmem>>, vector<1x32xf32>
      tpu.vector_store %arg9[%c0_18, %c0_19], %17 {strides = array<i32>} : memref<1x32xf32, #tpu.memory_space<vmem>>, vector<1x32xf32>,
    } else {
    }
    %c0 = arith.constant 0 : index
    %c0_1 = arith.constant 0 : index
    %c0_2 = arith.constant 0 : index
    %3 = vector.load %arg2[%c0, %c0_1, %c0_2] : memref<1x32x256xf32, #tpu.memory_space<vmem>>, vector<1x32x256xf32>
    %c0_3 = arith.constant 0 : index
    %c0_4 = arith.constant 0 : index
    %4 = vector.load %arg8[%c0_3, %c0_4] : memref<1x32xf32, #tpu.memory_space<vmem>>, vector<1x32xf32>
    %cst = arith.constant dense<0.000000e+00> : vector<1x32xf32>
    %5 = vector.multi_reduction <add>, %3, %cst [2] : vector<1x32x256xf32> to vector<1x32xf32>
    %6 = arith.addf %4, %5 : vector<1x32xf32>
    %c0_5 = arith.constant 0 : index
    %c0_6 = arith.constant 0 : index
    %7 = vector.load %arg8[%c0_5, %c0_6] : memref<1x32xf32, #tpu.memory_space<vmem>>, vector<1x32xf32>
    tpu.vector_store %arg8[%c0_5, %c0_6], %6 {strides = array<i32>} : memref<1x32xf32, #tpu.memory_space<vmem>>, vector<1x32xf32>,
    %c0_7 = arith.constant 0 : index
    %c0_8 = arith.constant 0 : index
    %8 = vector.load %arg9[%c0_7, %c0_8] : memref<1x32xf32, #tpu.memory_space<vmem>>, vector<1x32xf32>
    %cst_9 = arith.constant dense<0xFF800000> : vector<1x32xf32>
    %9 = vector.multi_reduction <maximumf>, %3, %cst_9 [2] : vector<1x32x256xf32> to vector<1x32xf32>
    %10 = arith.maximumf %8, %9 : vector<1x32xf32>
    %c0_10 = arith.constant 0 : index
    %c0_11 = arith.constant 0 : index
    %11 = vector.load %arg9[%c0_10, %c0_11] : memref<1x32xf32, #tpu.memory_space<vmem>>, vector<1x32xf32>
    tpu.vector_store %arg9[%c0_10, %c0_11], %10 {strides = array<i32>} : memref<1x32xf32, #tpu.memory_space<vmem>>, vector<1x32xf32>,
    %c0_i32_12 = arith.constant 0 : i32
    %12 = arith.cmpi eq, %arg1, %c0_i32_12 : i32
    %13 = arith.extui %12 : i1 to i32
    %c0_i32_13 = arith.constant 0 : i32
    %14 = arith.cmpi ne, %13, %c0_i32_13 : i32
    scf.if %14 {
      %c0_14 = arith.constant 0 : index
      %c0_15 = arith.constant 0 : index
      %15 = vector.load %arg3[%c0_14, %c0_15] : memref<2x32xf32, #tpu.memory_space<vmem>>, vector<2x32xf32>
      %c0_16 = arith.constant 0 : index
      %c0_17 = arith.constant 0 : index
      %16 = vector.load %arg5[%c0_16, %c0_17] : memref<2x32xf32, #tpu.memory_space<vmem>>, vector<2x32xf32>
      %c0_18 = arith.constant 0 : index
      %c0_19 = arith.constant 0 : index
      %17 = vector.load %arg6[%c0_18, %c0_19] : memref<1x32xf32, #tpu.memory_space<vmem>>, vector<1x32xf32>
      %c0_20 = arith.constant 0 : index
      %c0_21 = arith.constant 0 : index
      %18 = vector.load %arg8[%c0_20, %c0_21] : memref<1x32xf32, #tpu.memory_space<vmem>>, vector<1x32xf32>
      %cst_22 = arith.constant 3.906250e-03 : f32
      %19 = vector.broadcast %cst_22 : f32 to vector<1x32xf32>
      %20 = arith.mulf %18, %19 : vector<1x32xf32>
      %c0_23 = arith.constant 0 : index
      %c0_24 = arith.constant 0 : index
      %21 = vector.load %arg9[%c0_23, %c0_24] : memref<1x32xf32, #tpu.memory_space<vmem>>, vector<1x32xf32>
      %cst_25 = arith.constant 0.000000e+00 : f32
      %22 = vector.broadcast %cst_25 : f32 to vector<1x32xf32>
      %23 = vector.extract_strided_slice %15 {offsets = [0, 0], sizes = [1, 32], strides = [1, 1]} : vector<2x32xf32> to vector<1x32xf32>
      %24 = arith.mulf %20, %23 : vector<1x32xf32>
      %cst_26 = arith.constant dense<0.000000e+00> : vector<1xf32>
      %25 = vector.multi_reduction <add>, %24, %cst_26 [1] : vector<1x32xf32> to vector<1xf32>
      %26 = vector.shape_cast %25 : vector<1xf32> to vector<1x1xf32>
      %c0_27 = arith.constant 0 : index
      %27 = memref.load %arg4[%c0_27] : memref<2xf32, #tpu.memory_space<smem>>
      %28 = vector.broadcast %27 : f32 to vector<1x1xf32>
      %29 = arith.addf %26, %28 : vector<1x1xf32>
      %cst_28 = arith.constant 0.000000e+00 : f32
      %30 = vector.broadcast %cst_28 : f32 to vector<1x1xf32>
      %31 = arith.cmpf oge, %29, %30 : vector<1x1xf32>
      %cst_29 = arith.constant 1.000000e-01 : f32
      %32 = vector.broadcast %cst_29 : f32 to vector<1x1xf32>
      %33 = arith.mulf %32, %29 : vector<1x1xf32>
      %34 = arith.select %31, %29, %33 : vector<1x1xi1>, vector<1x1xf32>
      %35 = vector.extract_strided_slice %16 {offsets = [0, 0], sizes = [1, 32], strides = [1, 1]} : vector<2x32xf32> to vector<1x32xf32>
      %36 = vector.broadcast %34 : vector<1x1xf32> to vector<1x32xf32>
      %37 = arith.mulf %36, %35 : vector<1x32xf32>
      %38 = arith.addf %22, %37 : vector<1x32xf32>
      %39 = vector.extract_strided_slice %15 {offsets = [1, 0], sizes = [1, 32], strides = [1, 1]} : vector<2x32xf32> to vector<1x32xf32>
      %40 = arith.mulf %20, %39 : vector<1x32xf32>
      %cst_30 = arith.constant dense<0.000000e+00> : vector<1xf32>
      %41 = vector.multi_reduction <add>, %40, %cst_30 [1] : vector<1x32xf32> to vector<1xf32>
      %42 = vector.shape_cast %41 : vector<1xf32> to vector<1x1xf32>
      %c1 = arith.constant 1 : index
      %43 = memref.load %arg4[%c1] : memref<2xf32, #tpu.memory_space<smem>>
      %44 = vector.broadcast %43 : f32 to vector<1x1xf32>
      %45 = arith.addf %42, %44 : vector<1x1xf32>
      %cst_31 = arith.constant 0.000000e+00 : f32
      %46 = vector.broadcast %cst_31 : f32 to vector<1x1xf32>
      %47 = arith.cmpf oge, %45, %46 : vector<1x1xf32>
      %cst_32 = arith.constant 1.000000e-01 : f32
      %48 = vector.broadcast %cst_32 : f32 to vector<1x1xf32>
      %49 = arith.mulf %48, %45 : vector<1x1xf32>
      %50 = arith.select %47, %45, %49 : vector<1x1xi1>, vector<1x1xf32>
      %51 = vector.extract_strided_slice %16 {offsets = [1, 0], sizes = [1, 32], strides = [1, 1]} : vector<2x32xf32> to vector<1x32xf32>
      %52 = vector.broadcast %50 : vector<1x1xf32> to vector<1x32xf32>
      %53 = arith.mulf %52, %51 : vector<1x32xf32>
      %54 = arith.addf %38, %53 : vector<1x32xf32>
      %55 = arith.addf %54, %17 : vector<1x32xf32>
      %cst_33 = arith.constant 0.000000e+00 : f32
      %56 = vector.broadcast %cst_33 : f32 to vector<1x32xf32>
      %57 = vector.extract_strided_slice %15 {offsets = [0, 0], sizes = [1, 32], strides = [1, 1]} : vector<2x32xf32> to vector<1x32xf32>
      %58 = arith.mulf %21, %57 : vector<1x32xf32>
      %cst_34 = arith.constant dense<0.000000e+00> : vector<1xf32>
      %59 = vector.multi_reduction <add>, %58, %cst_34 [1] : vector<1x32xf32> to vector<1xf32>
      %60 = vector.shape_cast %59 : vector<1xf32> to vector<1x1xf32>
      %c0_35 = arith.constant 0 : index
      %61 = memref.load %arg4[%c0_35] : memref<2xf32, #tpu.memory_space<smem>>
      %62 = vector.broadcast %61 : f32 to vector<1x1xf32>
      %63 = arith.addf %60, %62 : vector<1x1xf32>
      %cst_36 = arith.constant 0.000000e+00 : f32
      %64 = vector.broadcast %cst_36 : f32 to vector<1x1xf32>
      %65 = arith.cmpf oge, %63, %64 : vector<1x1xf32>
      %cst_37 = arith.constant 1.000000e-01 : f32
      %66 = vector.broadcast %cst_37 : f32 to vector<1x1xf32>
      %67 = arith.mulf %66, %63 : vector<1x1xf32>
      %68 = arith.select %65, %63, %67 : vector<1x1xi1>, vector<1x1xf32>
      %69 = vector.extract_strided_slice %16 {offsets = [0, 0], sizes = [1, 32], strides = [1, 1]} : vector<2x32xf32> to vector<1x32xf32>
      %70 = vector.broadcast %68 : vector<1x1xf32> to vector<1x32xf32>
      %71 = arith.mulf %70, %69 : vector<1x32xf32>
      %72 = arith.addf %56, %71 : vector<1x32xf32>
      %73 = vector.extract_strided_slice %15 {offsets = [1, 0], sizes = [1, 32], strides = [1, 1]} : vector<2x32xf32> to vector<1x32xf32>
      %74 = arith.mulf %21, %73 : vector<1x32xf32>
      %cst_38 = arith.constant dense<0.000000e+00> : vector<1xf32>
      %75 = vector.multi_reduction <add>, %74, %cst_38 [1] : vector<1x32xf32> to vector<1xf32>
      %76 = vector.shape_cast %75 : vector<1xf32> to vector<1x1xf32>
      %c1_39 = arith.constant 1 : index
      %77 = memref.load %arg4[%c1_39] : memref<2xf32, #tpu.memory_space<smem>>
      %78 = vector.broadcast %77 : f32 to vector<1x1xf32>
      %79 = arith.addf %76, %78 : vector<1x1xf32>
      %cst_40 = arith.constant 0.000000e+00 : f32
      %80 = vector.broadcast %cst_40 : f32 to vector<1x1xf32>
      %81 = arith.cmpf oge, %79, %80 : vector<1x1xf32>
      %cst_41 = arith.constant 1.000000e-01 : f32
      %82 = vector.broadcast %cst_41 : f32 to vector<1x1xf32>
      %83 = arith.mulf %82, %79 : vector<1x1xf32>
      %84 = arith.select %81, %79, %83 : vector<1x1xi1>, vector<1x1xf32>
      %85 = vector.extract_strided_slice %16 {offsets = [1, 0], sizes = [1, 32], strides = [1, 1]} : vector<2x32xf32> to vector<1x32xf32>
      %86 = vector.broadcast %84 : vector<1x1xf32> to vector<1x32xf32>
      %87 = arith.mulf %86, %85 : vector<1x32xf32>
      %88 = arith.addf %72, %87 : vector<1x32xf32>
      %89 = arith.addf %88, %17 : vector<1x32xf32>
      %90 = arith.addf %55, %89 : vector<1x32xf32>
      %91 = arith.negf %90 : vector<1x32xf32>
      %92 = math.exp %91 : vector<1x32xf32>
      %cst_42 = arith.constant 1.000000e+00 : f32
      %93 = vector.broadcast %cst_42 : f32 to vector<1x32xf32>
      %94 = arith.addf %93, %92 : vector<1x32xf32>
      %95 = arith.divf %93, %94 : vector<1x32xf32>
      %c0_43 = arith.constant 0 : index
      %c0_44 = arith.constant 0 : index
      %c0_45 = arith.constant 0 : index
      %96 = vector.load %arg7[%c0_43, %c0_44, %c0_45] : memref<1x1x32xf32, #tpu.memory_space<vmem>>, vector<1x1x32xf32>
      %97 = vector.shape_cast %96 : vector<1x1x32xf32> to vector<1x32xf32>
      %98 = vector.shape_cast %95 : vector<1x32xf32> to vector<1x1x32xf32>
      tpu.vector_store %arg7[%c0_43, %c0_44, %c0_45], %98 {strides = array<i32>} : memref<1x1x32xf32, #tpu.memory_space<vmem>>, vector<1x1x32xf32>,
    } else {
    }
    return
  }
  func.func @transform_0(%arg0: i32, %arg1: i32) -> (i32, i32, i32) {
    %c0_i32 = arith.constant 0 : i32
    %c0_i32_0 = arith.constant 0 : i32
    return %arg0, %c0_i32, %arg1 : i32, i32, i32
  }
  func.func @transform_1(%arg0: i32, %arg1: i32) -> (i32, i32) {
    %c0_i32 = arith.constant 0 : i32
    %c0_i32_0 = arith.constant 0 : i32
    %c0_i32_1 = arith.constant 0 : i32
    return %c0_i32, %c0_i32_0 : i32, i32
  }
  func.func @transform_2(%arg0: i32, %arg1: i32) -> i32 {
    %c0_i32 = arith.constant 0 : i32
    %c0_i32_0 = arith.constant 0 : i32
    return %c0_i32 : i32
  }
  func.func @transform_3(%arg0: i32, %arg1: i32) -> (i32, i32) {
    %c0_i32 = arith.constant 0 : i32
    %c0_i32_0 = arith.constant 0 : i32
    %c0_i32_1 = arith.constant 0 : i32
    return %c0_i32, %c0_i32_0 : i32, i32
  }
  func.func @transform_4(%arg0: i32, %arg1: i32) -> (i32, i32) {
    %c0_i32 = arith.constant 0 : i32
    %c0_i32_0 = arith.constant 0 : i32
    %c0_i32_1 = arith.constant 0 : i32
    return %c0_i32, %c0_i32_0 : i32, i32
  }
  func.func @transform_5(%arg0: i32, %arg1: i32) -> (i32, i32, i32) {
    %c0_i32 = arith.constant 0 : i32
    %c0_i32_0 = arith.constant 0 : i32
    %c0_i32_1 = arith.constant 0 : i32
    return %arg0, %c0_i32, %c0_i32_0 : i32, i32, i32
  }
}

</mosaic_0001>

<bundles_post_ra>
// kernel: tpu_custom_call.1
= control target key start
LH: loop header
LB: loop body
LE: loop exit
PB: predicated region body
PF: predicated region fallthrough
CT: control target
= control target key end

     0   :  { %s1955_s0 = inlined_call_operand.hbm [shape: f32[2,32,256], index: 0, kind: input, shape index: {}]   ;;  %s1956_s1 = inlined_call_operand.hbm [shape: f32[2,32], index: 1, kind: input, shape index: {}]   ;;  %s1957_s2 = inlined_call_operand.vmem [shape: f32[2], index: 2, kind: input, shape index: {}]   ;;  %s1958_s3 = inlined_call_operand.vmem [shape: f32[2,32], index: 3, kind: input, shape index: {}]   ;;  %s1959_s4 = inlined_call_operand.vmem [shape: f32[1,32], index: 4, kind: input, shape index: {}]   ;;  %s1960_s5 = inlined_call_operand.hbm [shape: f32[2,1,32], index: 5, kind: output, shape index: {}]  }
   0x1   :  { %1969 = sst [smem:[#allocation17_spill]] %s1956_s1 }
   0x2   :  { %1970 = sst [smem:[#allocation18_spill]] %s1957_s2 }
   0x3   :  { %10 = vsyncpa [#allocation5], 0 }
   0x4   :  { %12 = vsyncpa [#allocation5 + $0x1], 0 }
   0x5   :  { %13 = vsyncpa [#allocation9], 0 }
   0x6   :  { %14 = vsyncpa [#allocation7], 0 }
   0x7   :  { %15 = vsyncpa [#allocation6], 0 }
   0x8   :  { %17 = vsyncpa [#allocation6 + $0x1], 0  ;;  %s1596_s18 = smov 0   ;;  %s1598_s19 = smov 0  }
   0x9   :  { %s1600_s20 = smov 0   ;;  %s1602_s21 = smov 0  }
   0xa   :  { %s1604_s22 = smov 0   ;;  %s1606_s23 = smov 0  }
   0xb LB: > { %1971 = sst [smem:[#allocation16_spill]] %s1554_s23  ;;  %s1283_s24 = sadd.s32 4294967295, %s1554_s23   ;;  %s1554_s23 = sphi %s1606_s23, %s23_s23   ;;  %s1550_s22 = sphi %s1604_s22, %s1994_s22   ;;  %s1546_s21 = sphi %s1602_s21, %s1993_s21   ;;  %s1542_s20 = sphi %s1600_s20, %s1992_s20   ;;  %s1538_s19 = sphi %s1598_s19, %s1991_s19   ;;  %s1534_s18 = sphi %s1596_s18, %s1990_s18  }
   0xc   : > { %s1284_s25 = sadd.s32 4294967294, %s1554_s23   ;;  %s44_s26 = sadd.s32 1, %s1542_s20 }
   0xd   : > { %p51_p0 = scmp.ne.s32.totalorder %s1542_s20, %s1538_s19  ;;  %p52_p1 = scmp.eq.s32.totalorder %s1554_s23, 0 }
   0xe   : > { %p57_p2 = scmp.ne.s32.totalorder %s1538_s19, %s1534_s18  ;;  %p1634_p3 = scmp.eq.s32.totalorder %s1283_s24, 0 }
   0xf   : > { %p165_p4 = scmp.eq.s32.totalorder %s1283_s24, 1  ;;  %p1638_p5 = por %p52_p1, %p51_p0 }
  0x10   : > { %s1972_s27 = scalar_select %p1634_p3, 1, 0 }
  0x11   : > { %p171_p6 = scmp.eq.s32.totalorder %s1284_s25, 1  ;;  %p1644_p7 = por %p1634_p3, %p57_p2 }
  0x12   : > { %p1648_p8 = por %p165_p4, %p51_p0  ;;  %p1285_p10 = scmp.ge.s32.totalorder %s1554_s23, 1 }
  0x13   : > { %s1974_s29 = scalar_select %p1644_p7, 1, 0 }
  0x14   : > { %s1975_s30 = scalar_select %p1648_p8, 1, 0 }
  0x15   : > { %p1652_p9 = por %p171_p6, %p57_p2  ;;  %p178_p11 = scmp.lt.s32.totalorder %s1554_s23, 3 }
  0x16   : > { %s1556_s8 = smov [#allocation8]   ;;  %p1331_p1 = scmp.lt.s32.totalorder %s1554_s23, 2 }
  0x17   : > { %s1976_s6 = scalar_select %p1652_p9, 1, 0 }
  0x18   : > { %p1659_p13 = pnand %p1285_p10, %p178_p11  ;;  %s191_s9 = sshll.u32 %s1556_s8, 4  ;;  %s192_s9 = int_to_ptr.vmem [resolvable:$true] %s191_s9 }
  0x19   : > { %s1978_s2 = sld [smem:[#allocation18_spill]]  ;;  %p1671_p2 = pnand %p1331_p1, %p1638_p5 }
  0x1a   : > { %s1977_s7 = scalar_select %p1659_p13, 1, 0 }
  0x1b   : > { %p1314_p0 = pneg %p1659_p13  ;;  %s1408_s15 = scalar_lea.vmem %s192_s9, 32 }
  0x1c   : > { %s1979_s13 = scalar_select %p1671_p2, 1, 0 }
  0x1d   : > { %p1677_p4 = pnand %p1314_p0, %p1634_p3  ;;  %p1409_p10 = scmp.ne.s32.totalorder %s192_s9, %s1408_s15 }
  0x1e   : > { %p1416_p5 = scmp.lt.s32.totalorder %s192_s9, %s192_s9  ;;  %p1417_p1 = scmp.lt.s32.totalorder %s1408_s15, %s1408_s15 }
  0x1f   : > { %s202_s12 = sshll.u32 %s1978_s2, 4  ;;  %p1399_p6 = pneg %p1677_p4  ;;  %s203_s12 = int_to_ptr.vmem [resolvable:$true] %s202_s12 }
  0x20   : > { %p1418_p9 = por %p1417_p1, %p1416_p5 }
  0x21   : > { %p1411_p11 = pnand %p1409_p10, %p1399_p6 }
  0x23   : > { %p1412_p12 = pneg %p1411_p11 }
  0x25   : > { %p1419_p8 = pnand %p1418_p9, %p1412_p12 }
  0x27   : > { %1422 = shalt.err (!%p1419_p8)
}
  0x28   : > { %s1981_s1 = sld [smem:[#allocation17_spill]]  ;;  %s1423_s24 = scalar_lea.vmem %s203_s12, 16 }
  0x29   : > { %p1424_p0 = scmp.ne.s32.totalorder %s203_s12, %s1423_s24  ;;  %p1431_p10 = scmp.lt.s32.totalorder %s203_s12, %s203_s12 }
  0x2a   : > { %p1432_p11 = scmp.lt.s32.totalorder %s1423_s24, %s1423_s24 }
  0x2b   : > { %p1426_p3 = pnand %p1424_p0, %p1399_p6 }
  0x2c   : > { %p1433_p13 = por %p1432_p11, %p1431_p10 }
  0x2d   : > { %p1427_p7 = pneg %p1426_p3 }
  0x2e   : > { %1317 = dma.hbm_to_vmem [thread:$0]  (!%p1677_p4), %s1981_s1, 32, %s192_s9, [#allocation9]  }
  0x2f   : > { %p1434_p2 = pnand %p1433_p13, %p1427_p7 }
  0x31   : > { %1437 = shalt.err (!%p1434_p2)
}
  0x32   : > { %s1557_s25 = smov [#allocation10]   ;;  %s35_s28 = sadd.s32 1, %s1550_s22 }
  0x33   : > { %1320 = dma.vmem_to_smem (!%p1677_p4), %s203_s12, 16, %s1557_s25, [#allocation7]  }
  0x34   : > { %s219_s8 = sand.u32 1, %s1542_s20   ;;  %p37_p8 = scmp.ge.s32.totalorder %s35_s28, 2 }
  0x35   : > { %s1289_s9 = sshll.u32 %s219_s8, 6  ;;  %s1301_s10 = sshll.u32 %s1550_s22, 10 }
  0x36   : > { %s1996_s28 = smov (%p37_p8, %s35_s28), 0  ;;  %s231_s14 = scalar_lea.hbm %s1955_s0, %s1301_s10 }
  0x37   : > { %s39_s16 = ssub.s32 %s1550_s22, %s1996_s28  ;;  %s223_s17 = scalar_lea.vmem [#allocation4], %s1289_s9 }
  0x38   : > { %s232_s24 = sshll.u32 %s223_s17, 4  ;;  %p42_p3 = scmp.eq.s32.totalorder %s39_s16, 0  ;;  %s233_s24 = int_to_ptr.vmem [resolvable:$true] %s232_s24 }
  0x39   : > { %s220_s12 = scalar_lea.sflag [#allocation5], %s219_s8  ;;  %p1982_p7 = scmp.ne.s32.totalorder %s1979_s13, 0 }
  0x3a   : > { %s1709_s1 = scalar_select %p42_p3, %s1542_s20, %s44_s26  }
  0x3b   : > { %p1440_p9 = pneg %p1982_p7  ;;  %s1451_s25 = scalar_lea.vmem %s233_s24, 1024 }
  0x3c   : > { %p1452_p12 = scmp.ne.s32.totalorder %s233_s24, %s1451_s25  ;;  %s1558_s2 = smov [#allocation4]  }
  0x3d   : > { %s1456_s23 = sshll.u32 %s1558_s2, 4  ;;  %s1457_s23 = int_to_ptr.vmem [resolvable:$false] %s1456_s23 }
  0x3e   : > { %p1454_p13 = pnand %p1452_p12, %p1440_p9  ;;  %s1458_s11 = scalar_lea.vmem %s1457_s23, 2048 }
  0x3f   : > { %p1459_p4 = scmp.lt.s32.totalorder %s233_s24, %s1457_s23  ;;  %p1460_p6 = scmp.lt.s32.totalorder %s1458_s11, %s1451_s25 }
  0x40   : > { %p1455_p2 = pneg %p1454_p13 }
  0x41   : > { %p1461_p5 = por %p1460_p6, %p1459_p4 }
  0x43   : > { %p1462_p1 = pnand %p1461_p5, %p1455_p2 }
  0x45   : > { %1465 = shalt.err (!%p1462_p1)
}
  0x46   : > { %s1559_s9 = smov 256   ;;  %s1560_s26 = smov 16  }
  0x47   : > { %1324 = dma.hbm_to_vmem [thread:$0]  (!%p1982_p7), %s231_s14, 1024, %s233_s24, %s220_s12, %s1559_s9, %s1559_s9, %s1560_s26  }
  0x48   : > { %p1983_p0 = scmp.ne.s32.totalorder %s1977_s7, 0 }
  0x49   : > { %s1718_s8 = sand.u32 (!%p1983_p0), 1, %s1538_s19   ;;  %p1984_p10 = scmp.ne.s32.totalorder (!%p1983_p0), %s1974_s29, 0 }
  0x4a   : > { %244 = sbr.rel (%p1983_p0) target bundleno = 617 (0x269), region = 40  ;;  %s1293_s2 = sshll.u32 (!%p1983_p0), %s1718_s8, 6 }
  0x4b   : > { %s247_s23 = scalar_lea.sflag (!%p1983_p0), [#allocation5], %s1718_s8  ;;  %s250_s10 = scalar_lea.vmem (!%p1983_p0), [#allocation4], %s1293_s2 }
  0x4f   : > { %1517 = dma.done.wait (%p1984_p10), %s247_s23, 1024  }
  0x50   : > { %1519 = vsyncadd (%p1984_p10), %s247_s23, 4294966272  ;;  %p1985_p11 = scmp.ne.s32.totalorder %s1972_s27, 0 }
  0x52   : > { %1521 = dma.done.wait (%p1985_p11), [#allocation9], 32  }
  0x53   : > { %1523 = vsyncadd (%p1985_p11), [#allocation9], 4294967264 }
  0x54   : > { %1525 = dma.done.wait (%p1985_p11), [#allocation7], 16  }
  0x55   : > { %1527 = vsyncadd (%p1985_p11), [#allocation7], 4294967280 }
  0x56   : > { %263 = sfence }
  0x57   : > { %v293_v0 = vld [vmem:[%s250_s10] sm:$0xff]  ;;  %v294_v1 = vld [vmem:[%s250_s10 + $0x8] sm:$0xff]  ;;  %v295_v2 = vld [vmem:[%s250_s10 + $0x10] sm:$0xff]  ;;  %v1561_v16 = vmov 0   ;;  %v318_v17 = vlaneseq  ;;  %v1562_v18 = vmov 1966171168  }
  0x58   : > { %v302_v3 = vadd.f32 %v294_v1, %v293_v0  ;;  %v296_v4 = vld [vmem:[%s250_s10 + $0x18] sm:$0xff]  ;;  %v297_v5 = vld [vmem:[%s250_s10 + $0x20] sm:$0xff]  ;;  %v298_v6 = vld [vmem:[%s250_s10 + $0x28] sm:$0xff]  ;;  %v700_v12 = vmax.f32 %v293_v0, %v294_v1  ;;  %1391 = vset.pattern.permute.xlu0 %v1561_v16  ;;  %1392 = vset.pattern.permute.xlu1 %v1561_v16  ;;  %v451_v19 = vunpack.c.l.s4 %v1562_v18  ;;  %vm290_vm0 = vcmask 253952   ;;  %s1296_s27 = sld [smem:[#allocation10 + $0x1]]  ;;  %s1298_s16 = sshll.u32 %s1546_s21, 4 }
  0x59   : > { %v308_v7 = vadd.f32 %v298_v6, %v297_v5  ;;  %v299_v8 = vld [vmem:[%s250_s10 + $0x30] sm:$0xff]  ;;  %v300_v9 = vld [vmem:[%s250_s10 + $0x38] sm:$0xff]  ;;  %v305_v10 = vadd.f32 %v296_v4, %v295_v2  ;;  %v703_v13 = vmax.f32 %v295_v2, %v296_v4  ;;  %v706_v14 = vmax.f32 %v297_v5, %v298_v6  ;;  %s1101_s29 = sld [smem:[#allocation10]]  ;;  %s284_s17 = scalar_lea.vmem [#allocation11], %s1718_s8 }
  0x5a   : > { %303 = vadd.xlane.f32.xlu0 %v302_v3  ;;  %v311_v11 = vadd.f32 %v300_v9, %v299_v8  ;;  %v709_v15 = vmax.f32 %v299_v8, %v300_v9  ;;  %v1735_v20 = vshrl.u32 %v318_v17, 7  ;;  %v452_v21 = vunpack.c.0.s8 %v451_v19  ;;  %s1184_s24 = sshll.u32 %s284_s17, 4  ;;  %s1912_s11 = scalar_lea.hbm %s1960_s5, %s1298_s16  ;;  %s1185_s24 = int_to_ptr.vmem [resolvable:$true] %s1184_s24 }
  0x5b   : > { %309 = vadd.xlane.f32.xlu1 %v308_v7  ;;  %vm665_vm1 = vcmask 130112   ;;  %vm672_vm2 = vcmask 195712   ;;  %vm679_vm3 = vcmask 261312   ;;  %s1172_s9 = scalar_lea.sflag [#allocation6], %s1718_s8  ;;  %s1466_s26 = scalar_lea.vmem %s1185_s24, 16 }
  0x5c   : > { %v1738_v22 = vsub.s32 0, %v1735_v20  ;;  %v1741_v23 = vsub.s32 1, %v1735_v20  ;;  %v1744_v24 = vsub.s32 2, %v1735_v20  ;;  %v1747_v25 = vsub.s32 3, %v1735_v20  ;;  %p1467_p8 = scmp.ne.s32.totalorder %s1185_s24, %s1466_s26  ;;  %p1986_p3 = scmp.ne.s32.totalorder %s1975_s30, 0 }
  0x5d   : > { %v1750_v26 = vsub.s32 4, %v1735_v20  ;;  %v1753_v27 = vsub.s32 5, %v1735_v20  ;;  %v1756_v28 = vsub.s32 6, %v1735_v20  ;;  %v1759_v29 = vsub.s32 7, %v1735_v20  ;;  %s1565_s2 = smov [#allocation11]  }
  0x5e   : > { %306 = vadd.xlane.f32.xlu0 %v305_v10  ;;  %v1762_v31 = vsub.s32 %v452_v21, %v1735_v20  ;;  %p1468_p7 = pnand %p1467_p8, %p1986_p3  ;;  %s1470_s23 = sshll.u32 %s1565_s2, 4  ;;  %s1471_s23 = int_to_ptr.vmem [resolvable:$false] %s1470_s23 }
  0x5f   : > { %312 = vadd.xlane.f32.xlu1 %v311_v11  ;;  %s1472_s21 = scalar_lea.vmem %s1471_s23, 32  ;;  %p1473_p12 = scmp.lt.s32.totalorder %s1185_s24, %s1471_s23 }
  0x60   : > { %p1469_p9 = pneg %p1468_p7  ;;  %p1474_p13 = scmp.lt.s32.totalorder %s1472_s21, %s1466_s26 }
  0x62   : > { %701 = vmax.xlane.f32.xlu0 %v700_v12  ;;  %p1475_p2 = por %p1474_p13, %p1473_p12 }
  0x63   : > { %704 = vmax.xlane.f32.xlu1 %v703_v13 }
  0x64   : > { %p1476_p4 = pnand %p1475_p2, %p1469_p9 }
  0x66   : > { %707 = vmax.xlane.f32.xlu0 %v706_v14 }
  0x67   : > { %710 = vmax.xlane.f32.xlu1 %v709_v15 }
  0xe3   : > { %v304_v30 = vpop.xlane.xlu0 %303 }
  0xe4   : > { %v310_v32 = vpop.xlane.xlu1 %309  ;;  %v321_v33 = vrot.slane %v304_v30, %v1738_v22  ;;  %v325_v34 = vrot.slane %v304_v30, %v1741_v23  ;;  %v329_v35 = vrot.slane %v304_v30, %v1744_v24  ;;  %v333_v36 = vrot.slane %v304_v30, %v1747_v25 }
  0xe5   : > { %v337_v37 = vrot.slane %v304_v30, %v1750_v26  ;;  %v341_v38 = vrot.slane %v304_v30, %v1753_v27  ;;  %v345_v39 = vrot.slane %v304_v30, %v1756_v28  ;;  %v349_v40 = vrot.slane %v304_v30, %v1759_v29 }
  0xe6   : > { %v446_v41 = vcombine.low %v321_v33, %v325_v34  ;;  %v447_v42 = vcombine.low %v329_v35, %v333_v36  ;;  %v385_v43 = vrot.slane %v310_v32, %v1738_v22  ;;  %v389_v44 = vrot.slane %v310_v32, %v1741_v23 }
  0xe7   : > { %v307_v45 = vpop.xlane.xlu0 %306  ;;  %v448_v46 = vcombine.low %v337_v37, %v341_v38  ;;  %v449_v47 = vcombine.low %v345_v39, %v349_v40  ;;  %v393_v48 = vrot.slane %v310_v32, %v1744_v24  ;;  %v397_v49 = vrot.slane %v310_v32, %v1747_v25 }
  0xe8   : > { %v456_v50 = vrot.slane %v446_v41, %v1762_v31  ;;  %v463_v51 = vrot.slane %v447_v42, %v1762_v31  ;;  %v353_v52 = vrot.slane %v307_v45, %v1738_v22  ;;  %v357_v53 = vrot.slane %v307_v45, %v1741_v23  ;;  %v313_v6 = vpop.xlane.xlu1 %312 }
  0xe9   : > { %v470_v54 = vrot.slane %v448_v46, %v1762_v31  ;;  %v477_v55 = vrot.slane %v449_v47, %v1762_v31  ;;  %v361_v56 = vrot.slane %v307_v45, %v1744_v24  ;;  %v365_v57 = vrot.slane %v307_v45, %v1747_v25 }
  0xea   : > { %v478_v58 = vcombine.low %v456_v50, %v463_v51  ;;  %v369_v59 = vrot.slane %v307_v45, %v1750_v26  ;;  %v373_v60 = vrot.slane %v307_v45, %v1753_v27  ;;  %v377_v61 = vrot.slane %v307_v45, %v1756_v28 }
  0xeb   : > { %v479_v62 = vcombine.low %v470_v54, %v477_v55  ;;  %v381_v63 = vrot.slane %v307_v45, %v1759_v29  ;;  %v495_v0 = vcombine.low %v353_v52, %v357_v53  ;;  %v496_v1 = vcombine.low %v361_v56, %v365_v57  ;;  %v702_v42 = vpop.xlane.xlu0 %701 }
  0xec   : > { %v486_v2 = vrot.slane %v478_v58, %v1762_v31  ;;  %v497_v3 = vcombine.low %v369_v59, %v373_v60  ;;  %v401_v4 = vrot.slane %v310_v32, %v1750_v26  ;;  %v405_v5 = vrot.slane %v310_v32, %v1753_v27  ;;  %v705_v59 = vpop.xlane.xlu1 %704 }
  0xed   : > { %v493_v7 = vrot.slane %v479_v62, %v1762_v31  ;;  %v498_v8 = vcombine.low %v377_v61, %v381_v63  ;;  %v505_v9 = vrot.slane %v495_v0, %v1762_v31  ;;  %v512_v10 = vrot.slane %v496_v1, %v1762_v31 }
  0xee   : > { %v519_v11 = vrot.slane %v497_v3, %v1762_v31  ;;  %v409_v12 = vrot.slane %v310_v32, %v1756_v28  ;;  %v413_v13 = vrot.slane %v310_v32, %v1759_v29  ;;  %v544_v14 = vcombine.low %v385_v43, %v389_v44 }
  0xef   : > { %v494_v15 = vcombine.low %v486_v2, %v493_v7  ;;  %v526_v16 = vrot.slane %v498_v8, %v1762_v31  ;;  %v527_v18 = vcombine.low %v505_v9, %v512_v10  ;;  %v545_v19 = vcombine.low %v393_v48, %v397_v49 }
  0xf0   : > { %v546_v21 = vcombine.low %v401_v4, %v405_v5  ;;  %v547_v30 = vcombine.low %v409_v12, %v413_v13  ;;  %v554_v33 = vrot.slane %v544_v14, %v1762_v31  ;;  %v417_v34 = vrot.slane %v313_v6, %v1738_v22 }
  0xf1   : > { %643 = vperm.xlu0 %1391, %v494_v15   ;;  %v528_v35 = vcombine.low %v519_v11, %v526_v16  ;;  %v535_v36 = vrot.slane %v527_v18, %v1762_v31  ;;  %v561_v37 = vrot.slane %v545_v19, %v1762_v31  ;;  %v421_v32 = vrot.slane %v313_v6, %v1741_v23 }
  0xf2   : > { %v568_v38 = vrot.slane %v546_v21, %v1762_v31  ;;  %v575_v39 = vrot.slane %v547_v30, %v1762_v31  ;;  %v425_v40 = vrot.slane %v313_v6, %v1744_v24  ;;  %v429_v41 = vrot.slane %v313_v6, %v1747_v25  ;;  %v708_v30 = vpop.xlane.xlu0 %707 }
  0xf3   : > { %v542_v43 = vrot.slane %v528_v35, %v1762_v31  ;;  %v576_v44 = vcombine.low %v554_v33, %v561_v37  ;;  %v433_v45 = vrot.slane %v313_v6, %v1750_v26  ;;  %v437_v46 = vrot.slane %v313_v6, %v1753_v27 }
  0xf4   : > { %v577_v47 = vcombine.low %v568_v38, %v575_v39  ;;  %v441_v48 = vrot.slane %v313_v6, %v1756_v28  ;;  %v445_v49 = vrot.slane %v313_v6, %v1759_v29  ;;  %v593_v50 = vcombine.low %v417_v34, %v421_v32 }
  0xf5   : > { %v543_v51 = vcombine.low %v535_v36, %v542_v43  ;;  %v584_v52 = vrot.slane %v576_v44, %v1762_v31  ;;  %v594_v53 = vcombine.low %v425_v40, %v429_v41  ;;  %v595_v54 = vcombine.low %v433_v45, %v437_v46 }
  0xf6   : > { %v591_v55 = vrot.slane %v577_v47, %v1762_v31  ;;  %v596_v56 = vcombine.low %v441_v48, %v445_v49  ;;  %v603_v57 = vrot.slane %v593_v50, %v1762_v31  ;;  %v719_v58 = vrot.slane %v702_v42, %v1738_v22 }
  0xf7   : > { %646 = vperm.xlu1 %1392, %v543_v51   ;;  %v610_v60 = vrot.slane %v594_v53, %v1762_v31  ;;  %v617_v61 = vrot.slane %v595_v54, %v1762_v31  ;;  %v723_v62 = vrot.slane %v702_v42, %v1741_v23  ;;  %v727_v63 = vrot.slane %v702_v42, %v1744_v24 }
  0xf8   : > { %v592_v0 = vcombine.low %v584_v52, %v591_v55  ;;  %v624_v1 = vrot.slane %v596_v56, %v1762_v31  ;;  %v731_v2 = vrot.slane %v702_v42, %v1747_v25  ;;  %v735_v3 = vrot.slane %v702_v42, %v1750_v26  ;;  %v711_v52 = vpop.xlane.xlu1 %710 }
  0xf9   : > { %v625_v4 = vcombine.low %v603_v57, %v610_v60  ;;  %v739_v5 = vrot.slane %v702_v42, %v1753_v27  ;;  %v743_v6 = vrot.slane %v702_v42, %v1756_v28  ;;  %v747_v7 = vrot.slane %v702_v42, %v1759_v29 }
  0xfa   : > { %v626_v8 = vcombine.low %v617_v61, %v624_v1  ;;  %v844_v9 = vcombine.low %v719_v58, %v723_v62  ;;  %v845_v10 = vcombine.low %v727_v63, %v731_v2  ;;  %v751_v11 = vrot.slane %v705_v59, %v1738_v22 }
  0xfb   : > { %649 = vperm.xlu1 %1392, %v592_v0   ;;  %v633_v12 = vrot.slane %v625_v4, %v1762_v31  ;;  %v846_v13 = vcombine.low %v735_v3, %v739_v5  ;;  %v847_v14 = vcombine.low %v743_v6, %v747_v7  ;;  %v755_v15 = vrot.slane %v705_v59, %v1741_v23 }
  0xfc   : > { %v640_v16 = vrot.slane %v626_v8, %v1762_v31  ;;  %v854_v18 = vrot.slane %v844_v9, %v1762_v31  ;;  %v861_v19 = vrot.slane %v845_v10, %v1762_v31  ;;  %v759_v21 = vrot.slane %v705_v59, %v1744_v24 }
  0xfd   : > { %v868_v33 = vrot.slane %v846_v13, %v1762_v31  ;;  %v875_v34 = vrot.slane %v847_v14, %v1762_v31  ;;  %v763_v35 = vrot.slane %v705_v59, %v1747_v25  ;;  %v767_v36 = vrot.slane %v705_v59, %v1750_v26 }
  0xfe   : > { %v641_v37 = vcombine.low %v633_v12, %v640_v16  ;;  %v876_v32 = vcombine.low %v854_v18, %v861_v19  ;;  %v771_v38 = vrot.slane %v705_v59, %v1753_v27  ;;  %v775_v39 = vrot.slane %v705_v59, %v1756_v28 }
  0xff   : > { %v877_v40 = vcombine.low %v868_v33, %v875_v34  ;;  %v779_v41 = vrot.slane %v705_v59, %v1759_v29  ;;  %v893_v42 = vcombine.low %v751_v11, %v755_v15  ;;  %v894_v43 = vcombine.low %v759_v21, %v763_v35 }
 0x100   : > { %652 = vperm.xlu1 %1392, %v641_v37   ;;  %v884_v44 = vrot.slane %v876_v32, %v1762_v31  ;;  %v895_v45 = vcombine.low %v767_v36, %v771_v38  ;;  %v783_v46 = vrot.slane %v708_v30, %v1738_v22  ;;  %v787_v47 = vrot.slane %v708_v30, %v1741_v23 }
 0x101   : > { %v891_v48 = vrot.slane %v877_v40, %v1762_v31  ;;  %v896_v49 = vcombine.low %v775_v39, %v779_v41  ;;  %v903_v50 = vrot.slane %v893_v42, %v1762_v31  ;;  %v910_v51 = vrot.slane %v894_v43, %v1762_v31 }
 0x102   : > { %v917_v53 = vrot.slane %v895_v45, %v1762_v31  ;;  %v791_v54 = vrot.slane %v708_v30, %v1744_v24  ;;  %v795_v55 = vrot.slane %v708_v30, %v1747_v25  ;;  %v799_v56 = vrot.slane %v708_v30, %v1750_v26 }
 0x103   : > { %v892_v57 = vcombine.low %v884_v44, %v891_v48  ;;  %v924_v58 = vrot.slane %v896_v49, %v1762_v31  ;;  %v925_v59 = vcombine.low %v903_v50, %v910_v51  ;;  %v803_v60 = vrot.slane %v708_v30, %v1753_v27 }
 0x104   : > { %v807_v61 = vrot.slane %v708_v30, %v1756_v28  ;;  %v811_v62 = vrot.slane %v708_v30, %v1759_v29  ;;  %v942_v63 = vcombine.low %v783_v46, %v787_v47  ;;  %v943_v0 = vcombine.low %v791_v54, %v795_v55 }
 0x105   : > { %1041 = vperm.xlu1 %1392, %v892_v57   ;;  %v926_v1 = vcombine.low %v917_v53, %v924_v58  ;;  %v933_v2 = vrot.slane %v925_v59, %v1762_v31  ;;  %v944_v3 = vcombine.low %v799_v56, %v803_v60  ;;  %v815_v4 = vrot.slane %v711_v52, %v1738_v22 }
 0x106   : > { %v945_v5 = vcombine.low %v807_v61, %v811_v62  ;;  %v952_v6 = vrot.slane %v942_v63, %v1762_v31  ;;  %v959_v7 = vrot.slane %v943_v0, %v1762_v31  ;;  %v819_v8 = vrot.slane %v711_v52, %v1741_v23  ;;  %v1091_v63 = vld [vmem:[#allocation8] sm:$0x3] }
 0x107   : > { %v940_v9 = vrot.slane %v926_v1, %v1762_v31  ;;  %v966_v10 = vrot.slane %v944_v3, %v1762_v31  ;;  %v823_v11 = vrot.slane %v711_v52, %v1744_v24  ;;  %v827_v12 = vrot.slane %v711_v52, %v1747_v25 }
 0x108   : > { %v973_v13 = vrot.slane %v945_v5, %v1762_v31  ;;  %v974_v14 = vcombine.low %v952_v6, %v959_v7  ;;  %v831_v22 = vrot.slane %v711_v52, %v1750_v26  ;;  %v835_v15 = vrot.slane %v711_v52, %v1753_v27 }
 0x109   : > { %v941_v16 = vcombine.low %v933_v2, %v940_v9  ;;  %v839_v18 = vrot.slane %v711_v52, %v1756_v28  ;;  %v843_v23 = vrot.slane %v711_v52, %v1759_v29  ;;  %v991_v19 = vcombine.low %v815_v4, %v819_v8 }
 0x10a   : > { %v975_v21 = vcombine.low %v966_v10, %v973_v13  ;;  %v982_v30 = vrot.slane %v974_v14, %v1762_v31  ;;  %v992_v33 = vcombine.low %v823_v11, %v827_v12  ;;  %v993_v24 = vcombine.low %v831_v22, %v835_v15 }
 0x10b   : > { %1044 = vperm.xlu1 %1392, %v941_v16   ;;  %v994_v25 = vcombine.low %v839_v18, %v843_v23  ;;  %v1001_v34 = vrot.slane %v991_v19, %v1762_v31  ;;  %v1563_v38 = vmov 0.0   ;;  %v1564_v40 = vmov -inf  }
 0x10c   : > { %v989_v35 = vrot.slane %v975_v21, %v1762_v31  ;;  %v1008_v26 = vrot.slane %v992_v33, %v1762_v31  ;;  %v1015_v27 = vrot.slane %v993_v24, %v1762_v31  ;;  %291 = vst.msk [vmem:[#allocation2] sm:$0x1] %vm290_vm0, %v1563_v38  ;;  %292 = vst.msk [vmem:[#allocation3] sm:$0x1] %vm290_vm0, %v1564_v40  ;;  %v655_v42 = vand.u32 127, %v318_v17 }
 0x10d   : > { %v1022_v28 = vrot.slane %v994_v25, %v1762_v31  ;;  %v1116_v1 = vrot.slane %v1091_v63, %v1762_v31 }
 0x10e   : > { %v990_v36 = vcombine.low %v982_v30, %v989_v35  ;;  %v1023_v29 = vcombine.low %v1001_v34, %v1008_v26  ;;  %v660_v43 = vadd.s32 4294967288, %v655_v42  ;;  %v667_v44 = vadd.s32 4294967280, %v655_v42 }
 0x10f   : > { %v1024_v37 = vcombine.low %v1015_v27, %v1022_v28  ;;  %v674_v47 = vadd.s32 4294967272, %v655_v42  ;;  %v658_v49 = vsub.s32 %v655_v42, %v1735_v20  ;;  %v1117_v3 = vcombine.high %v1116_v1, %v1116_v1 }
 0x110   : > { %1047 = vperm.xlu1 %1392, %v990_v36   ;;  %v1031_v32 = vrot.slane %v1023_v29, %v1762_v31  ;;  %v663_v46 = vsub.s32 %v660_v43, %v1735_v20  ;;  %v670_v48 = vsub.s32 %v667_v44, %v1735_v20  ;;  %v1131_v27 = vstv %s1296_s27 }
 0x111   : > { %v1038_v39 = vrot.slane %v1024_v37, %v1762_v31  ;;  %v677_v53 = vsub.s32 %v674_v47, %v1735_v20  ;;  %v1124_v5 = vrot.slane %v1117_v3, %v1762_v31  ;;  %v1102_v36 = vstv %s1101_s29 }
 0x113   : > { %v1039_v41 = vcombine.low %v1031_v32, %v1038_v39  ;;  %v301_v61 = vld [vmem:[#allocation2] sm:$0x1]  ;;  %v699_v21 = vld [vmem:[#allocation3] sm:$0x1] }
 0x114   : > { %v1092_v32 = vld [vmem:[%s1958_s3] sm:$0x3] }
 0x115   : > { %1050 = vperm.xlu1 %1392, %v1039_v41   ;;  %v1137_v40 = vrot.slane %v1092_v32, 1 }
 0x16c   : > { %v644_v51 = vpop.permute.xlu0 %643 }
 0x16d   : > { %v659_v55 = vrot.slane %v644_v51, %v658_v49 }
 0x172   : > { %v647_v45 = vpop.permute.xlu1 %646 }
 0x173   : > { %v664_v52 = vrot.slane %v647_v45, %v663_v46 }
 0x175   : > { %v666_v56 = vsel %vm665_vm1, %v664_v52, %v659_v55 }
 0x176   : > { %v650_v50 = vpop.permute.xlu1 %649 }
 0x177   : > { %v671_v54 = vrot.slane %v650_v50, %v670_v48 }
 0x179   : > { %v673_v58 = vsel %vm672_vm2, %v671_v54, %v666_v56 }
 0x17b   : > { %v653_v17 = vpop.permute.xlu1 %652 }
 0x17c   : > { %v678_v57 = vrot.slane %v653_v17, %v677_v53  ;;  %v1093_v17 = vld [vmem:[%s1959_s4] sm:$0x1] }
 0x17e   : > { %v680_v59 = vsel %vm679_vm3, %v678_v57, %v673_v58 }
 0x17f   : > { %v687_v60 = vrot.slane %v680_v59, %v1762_v31 }
 0x180   : > { %v1042_v62 = vpop.permute.xlu1 %1041 }
 0x181   : > { %v694_v20 = vrot.slane %v687_v60, %v1762_v31  ;;  %v1055_v10 = vrot.slane %v1042_v62, %v658_v49 }
 0x183   : > { %v696_v0 = vadd.f32 %v694_v20, %v301_v61 }
 0x185   : > { %698 = vst.msk [vmem:[#allocation2] sm:$0x1] %vm290_vm0, %v696_v0 }
 0x186   : > { %v1045_v2 = vpop.permute.xlu1 %1044 }
 0x187   : > { %v1059_v7 = vrot.slane %v1045_v2, %v663_v46 }
 0x189   : > { %v1060_v14 = vsel %vm665_vm1, %v1059_v7, %v1055_v10 }
 0x18b   : > { %v1048_v4 = vpop.permute.xlu1 %1047 }
 0x18c   : > { %v1094_v6 = vld [vmem:[#allocation2] sm:$0x1]  ;;  %v1064_v9 = vrot.slane %v1048_v4, %v670_v48 }
 0x18d   : > { %v1095_v8 = vmul.f32 0.00390625, %v1094_v6 }
 0x18e   : > { %v1065_v18 = vsel %vm672_vm2, %v1064_v9, %v1060_v14 }
 0x18f   : > { %v1126_v11 = vmul.f32 %v1124_v5, %v1095_v8  ;;  %v1097_v12 = vmul.f32 %v1095_v8, %v1091_v63 }
 0x190   : > { %v1051_v13 = vpop.permute.xlu1 %1050 }
 0x191   : > { %v1069_v22 = vrot.slane %v1051_v13, %v677_v53  ;;  %v1127_v15 = vsel %vm290_vm0, %v1126_v11, 0.0  ;;  %v1098_v16 = vsel %vm290_vm0, %v1097_v12, 0.0 }
 0x192   : > { %1128 = vadd.xlane.f32.xlu0 %v1127_v15  ;;  %1099 = vadd.xlane.f32.xlu1 %v1098_v16 }
 0x193   : > { %v1070_v23 = vsel %vm679_vm3, %v1069_v22, %v1065_v18 }
 0x194   : > { %v1077_v19 = vrot.slane %v1070_v23, %v1762_v31 }
 0x196   : > { %v1084_v30 = vrot.slane %v1077_v19, %v1762_v31 }
 0x198   : > { %v1086_v33 = vmax.f32 %v699_v21, %v1084_v30 }
 0x19a   : > { %1087 = vst.msk [vmem:[#allocation3] sm:$0x1] %vm290_vm0, %v1086_v33 }
 0x1a1   : > { %v1096_v24 = vld [vmem:[#allocation3] sm:$0x1] }
 0x1a2   : > { %v1142_v25 = vmul.f32 %v1096_v24, %v1091_v63  ;;  %v1152_v34 = vmul.f32 %v1124_v5, %v1096_v24 }
 0x1a4   : > { %v1143_v35 = vsel %vm290_vm0, %v1142_v25, 0.0  ;;  %v1153_v26 = vsel %vm290_vm0, %v1152_v34, 0.0 }
 0x1a5   : > { %1144 = vadd.xlane.f32.xlu0 %v1143_v35  ;;  %1154 = vadd.xlane.f32.xlu1 %v1153_v26 }
 0x21b   : > { %v1129_v28 = vpop.xlane.xlu0 %1128  ;;  %v1100_v29 = vpop.xlane.xlu1 %1099 }
 0x21c   : > { %v1132_v37 = vadd.f32 %v1131_v27, %v1129_v28  ;;  %v1103_v31 = vadd.f32 %v1102_v36, %v1100_v29 }
 0x21e   : > { %v1134_v38 = vmul.f32 0.1, %v1132_v37  ;;  %v1105_v39 = vmul.f32 0.1, %v1103_v31  ;;  %vm1133_vm4 = vcmp.ge.f32.partialorder %v1132_v37, 0.0  ;;  %vm1104_vm5 = vcmp.ge.f32.partialorder %v1103_v31, 0.0 }
 0x220   : > { %v1135_v41 = vsel %vm1133_vm4, %v1132_v37, %v1134_v38  ;;  %v1106_v42 = vsel %vm1104_vm5, %v1103_v31, %v1105_v39 }
 0x221   : > { %v1139_v47 = vmul.f32 %v1137_v40, %v1135_v41  ;;  %v1107_v48 = vmul.f32 %v1106_v42, %v1092_v32 }
 0x223   : > { %v1140_v53 = vadd.f32 %v1139_v47, %v1107_v48 }
 0x225   : > { %v1141_v57 = vadd.f32 %v1140_v53, %v1093_v17 }
 0x22e   : > { %v1145_v43 = vpop.xlane.xlu0 %1144  ;;  %v1155_v44 = vpop.xlane.xlu1 %1154 }
 0x22f   : > { %v1146_v45 = vadd.f32 %v1145_v43, %v1102_v36  ;;  %v1156_v46 = vadd.f32 %v1155_v44, %v1131_v27 }
 0x231   : > { %vm1147_vm6 = vcmp.ge.f32.partialorder %v1146_v45, 0.0  ;;  %v1148_v49 = vmul.f32 0.1, %v1146_v45  ;;  %vm1157_vm7 = vcmp.ge.f32.partialorder %v1156_v46, 0.0  ;;  %v1158_v50 = vmul.f32 0.1, %v1156_v46 }
 0x233   : > { %v1149_v51 = vsel %vm1147_vm6, %v1146_v45, %v1148_v49  ;;  %v1159_v52 = vsel %vm1157_vm7, %v1156_v46, %v1158_v50 }
 0x234   : > { %v1150_v54 = vmul.f32 %v1149_v51, %v1092_v32  ;;  %v1160_v55 = vmul.f32 %v1159_v52, %v1137_v40 }
 0x236   : > { %v1161_v56 = vadd.f32 %v1160_v55, %v1150_v54 }
 0x238   : > { %v1162_v58 = vadd.f32 %v1161_v56, %v1093_v17 }
 0x23a   : > { %v1163_v59 = vadd.f32 %v1162_v58, %v1141_v57 }
 0x23c   : > { %v1297_v60 = vmul.f32 -1.442695, %v1163_v59 }
 0x23e   : > { %1393 = vpow2.f32 %v1297_v60 }
 0x24b   : > { %v1394_v61 = vpop.eup %1393 }
 0x24c   : > { %v1167_v62 = vadd.f32 1.0, %v1394_v61 }
 0x24e   : > { %1395 = vrcp.f32 %v1167_v62 }
 0x25b   : > { %v1396_v63 = vpop.eup %1395 }
 0x25c   : > { %1170 = vst.msk [vmem:[%s284_s17] sm:$0x1] %vm290_vm0, %v1396_v63 }
 0x25d   : > { %1479 = shalt.err (!%p1476_p4)
}
 0x25e   : > { %s1480_s10 = scalar_lea.hbm %s1912_s11, 16  ;;  %s1484_s29 = scalar_lea.hbm %s1960_s5, 32 }
 0x25f   : > { %p1481_p6 = scmp.ne.s32.totalorder %s1912_s11, %s1480_s10  ;;  %p1485_p0 = scmp.lt.s32.totalorder %s1912_s11, %s1960_s5 }
 0x260   : > { %p1486_p10 = scmp.lt.s32.totalorder %s1484_s29, %s1480_s10 }
 0x261   : > { %p1482_p5 = pnand %p1481_p6, %p1986_p3 }
 0x262   : > { %p1487_p11 = por %p1486_p10, %p1485_p0 }
 0x263   : > { %p1483_p1 = pneg %p1482_p5 }
 0x265   : > { %p1488_p8 = pnand %p1487_p11, %p1483_p1 }
 0x267   : > { %1491 = shalt.err (!%p1488_p8)
}
 0x268   : > { %1312 = dma.vmem_to_hbm [thread:$0]  (%p1986_p3), %s1185_s24, 16, %s1912_s11, %s1172_s9  }
 0x269 PF: > { %s1987_s15 = sld [smem:[#allocation16_spill]]  ;;  %s1196_s14 = sand.u32 1, %s1534_s18  }
 0x26a   : > { %p1988_p7 = scmp.ne.s32.totalorder %s1976_s6, 0  ;;  %s1197_s16 = scalar_lea.sflag [#allocation6], %s1196_s14 }
 0x26f   : > { %p1989_p9 = scmp.ge.s32.totalorder %s1987_s15, 2 }
 0x271   : > { %p1326_p12 = pnand %p1989_p9, %p1988_p7 }
 0x273   : > { %p1327_p13 = pneg %p1326_p12 }
 0x275   : > { %1529 = dma.done.wait (%p1327_p13), %s1197_s16, 16  }
 0x276   : > { %1531 = vsyncadd (%p1327_p13), %s1197_s16, 4294967280  ;;  %s23_s23 = sadd.s32 1, %s1987_s15   ;;  %s1990_s18 = smov %s1538_s19 }
 0x277   : > { %p20_p2 = scmp.ge.s32.totalorder %s23_s23, 4   ;;  %s1991_s19 = smov %s1542_s20 }
 0x278   : > { %s1992_s20 = smov %s1709_s1  ;;  %s1993_s21 = smov %s1550_s22 }
 0x279   : > { %s1994_s22 = smov %s1996_s28  ;;  %22 = sbr.rel (!%p20_p2) target bundleno = 11 (0xb), region = 102 }
 0x27e   :  { %1201 = vsyncpa [#allocation5], 1 }
 0x27f   :  { %1203 = vsyncpa [#allocation5 + $0x1], 1 }
 0x280   :  { %1204 = vsyncpa [#allocation9], 1 }
 0x281   :  { %1205 = vsyncpa [#allocation6], 1 }
 0x282   :  { %1207 = vsyncpa [#allocation6 + $0x1], 1 }
 0x283   :  { %1208 = vsyncpa [#allocation7], 1 }
 0x284   :  { %1210 = vsyncpa [#allocation7 + $0x1], 1 }

</bundles_post_ra>
